<compile_context>
chip_gen: v7x
topology: tpu7x:2x2x1
jax: 0.10.0
libtpu: 0.0.40
codegen_flags: <defaults>
</compile_context>

<pallas_src>
import math

import jax
import jax.numpy as jnp
from jax.experimental import pallas as pl
from jax.experimental.pallas import tpu as pltpu

_MIB = 1 << 20


# ----------------------------------------------------------------------------
# Parameter ("buffer") setup: sinusoidal positional-encoding table, 2-D form.
# ----------------------------------------------------------------------------
def make_pe_table(d_model: int, max_len: int = 5000, dtype=jnp.float32):
    """Returns pe as (max_len, d_model); equals the PyTorch buffer pe[:, 0, :]."""
    position = jnp.arange(max_len, dtype=jnp.float32)[:, None]            # (L, 1)
    div_term = jnp.exp(
        jnp.arange(0, d_model, 2, dtype=jnp.float32)
        * (-math.log(10000.0) / d_model)
    )                                                                      # (D/2,)
    angles = position * div_term                                           # (L, D/2)
    pe = jnp.zeros((max_len, d_model), dtype=jnp.float32)
    pe = pe.at[:, 0::2].set(jnp.sin(angles))
    pe = pe.at[:, 1::2].set(jnp.cos(angles))
    return pe.astype(dtype)                                                # (L, D)


# ----------------------------------------------------------------------------
# Kernels
# ----------------------------------------------------------------------------
def _add_pe_kernel_2d(x_ref, pe_ref, o_ref):
    """x2d[tile_s, B*D] += pe[tile_s, D], broadcast over B lane groups.

    Static, 128-aligned lane-group slices (D % 128 == 0 or B == 1) -> no
    concatenate / pe replication, dense unmasked stores.
    """
    pe = pe_ref[...]                       # (tile_s, D)
    d = pe.shape[-1]
    b = x_ref.shape[-1] // d               # static batch factor
    for j in range(b):                     # static Python loop, fully unrolled
        sl = slice(j * d, (j + 1) * d)
        o_ref[:, sl] = (x_ref[:, sl] + pe).astype(o_ref.dtype)


def _add_pe_kernel_3d(x_ref, pe_ref, o_ref):
    """Fallback for D not a multiple of 128: x[tile_s, B, D] + pe[tile_s, 1, D]."""
    o_ref[...] = (x_ref[...] + pe_ref[...][:, None, :]).astype(o_ref.dtype)


# ----------------------------------------------------------------------------
# Chip-aware tiling
# ----------------------------------------------------------------------------
def _chip_config():
    """Returns (tensorcores_per_chip, target_block_bytes) for the local device."""
    try:
        kind = jax.devices()[0].device_kind.lower()
    except Exception:
        kind = ""
    is_v5e = any(t in kind for t in ("v5e", "v5 lite", "v5lite"))
    is_v6e = any(t in kind for t in ("v6e", "v6 lite", "v6lite"))
    single_tc = is_v5e or is_v6e
    num_tc = 1 if single_tc else 2          # v7x / v5p / v4 / unknown -> 2 TCs
    # Per-block VMEM budget.  Double-buffered x/out/pe blocks then total
    # ~9 MiB (v5e, 16 MiB default scoped VMEM) or ~17 MiB (others, 32 MiB
    # default), so no vmem_limit_bytes override is required anywhere.
    target = 2 * _MIB if is_v5e else 4 * _MIB
    return num_tc, target


def _round_up(a: int, m: int) -> int:
    return -(-a // m) * m


def _choose_tile_s(S: int, row_bytes: int, itemsize: int,
                   target_block_bytes: int, num_tc: int) -> int:
    # Sublane multiple for this dtype (f32: 8, bf16: 16, int8/fp8: 32).
    sub = 8 * max(1, 4 // max(itemsize, 1))
    # Largest sublane-aligned row count the per-block VMEM budget allows.
    cap = max(sub, (target_block_bytes // max(row_bytes, 1)) // sub * sub)
    s_pad = _round_up(S, sub)
    steps = max(1, -(-s_pad // cap))
    # Multi-TensorCore chips: round the grid length up to a multiple of the TC
    # count so the single "parallel" axis shards evenly across cores.  Single
    # TC chips (v5e/v6e) are NOT forced to >=2 steps.
    if num_tc > 1 and (s_pad // sub) >= num_tc:
        steps = _round_up(steps, num_tc)
    tile_s = _round_up(-(-S // steps), sub)
    return min(tile_s, s_pad)


# ----------------------------------------------------------------------------
# Forward wrapper
# ----------------------------------------------------------------------------
def positional_encoding_forward(x, pe):
    """Forward of PositionalEncoding (batch_first=False, eval-mode dropout).

    x:  (seq_len, batch, d_model)
    pe: (max_len, d_model)  -- equals the PyTorch buffer pe[:, 0, :]
    """
    S, B, D = x.shape
    max_len = pe.shape[0]
    assert S <= max_len, f"seq_len={S} exceeds positional-encoding max_len={max_len}"
    if pe.dtype != x.dtype:
        # NOTE: PyTorch keeps the pe buffer in float32 and promotes the add;
        # here pe is cast to x.dtype (numerically minor for bf16 inputs).
        pe = pe.astype(x.dtype)

    itemsize = jnp.dtype(x.dtype).itemsize
    num_tc, target_block_bytes = _chip_config()
    row_bytes = B * D * itemsize
    tile_s = _choose_tile_s(S, row_bytes, itemsize, target_block_bytes, num_tc)
    grid = (pl.cdiv(S, tile_s),)
    cparams = pltpu.CompilerParams(dimension_semantics=("parallel",))

    if B == 1 or D % 128 == 0:
        # Fast path: lane-dense 2-D slab; per-batch-group lane slices inside
        # the kernel are 128-aligned -> unmasked dense vst.
        x2 = x.reshape(S, B * D)     # free view when x is contiguous row-major
        out2 = pl.pallas_call(
            _add_pe_kernel_2d,
            out_shape=jax.ShapeDtypeStruct((S, B * D), x.dtype),
            grid_spec=pltpu.PrefetchScalarGridSpec(
                num_scalar_prefetch=0,
                grid=grid,
                in_specs=[
                    # Last dims equal the full array dims -> (8,128) rule OK;
                    # tile_s is a multiple of the dtype's sublane count.
                    pl.BlockSpec((tile_s, B * D), lambda i: (i, 0)),
                    # Full pe table passed; only the first ceil(S/tile_s)
                    # blocks are ever addressed by this index_map.
                    pl.BlockSpec((tile_s, D), lambda i: (i, 0)),
                ],
                out_specs=pl.BlockSpec((tile_s, B * D), lambda i: (i, 0)),
            ),
            compiler_params=cparams,
            input_output_aliases={0: 0},   # in-place add when x is donated
        )(x2, pe)
        out = out2.reshape(S, B, D)
    else:
        # Fallback: 3-D blocks whose trailing (B, D) dims equal the full array
        # dims, so no misaligned lane slicing is needed.
        out = pl.pallas_call(
            _add_pe_kernel_3d,
            out_shape=jax.ShapeDtypeStruct((S, B, D), x.dtype),
            grid_spec=pltpu.PrefetchScalarGridSpec(
                num_scalar_prefetch=0,
                grid=grid,
                in_specs=[
                    pl.BlockSpec((tile_s, B, D), lambda i: (i, 0, 0)),
                    pl.BlockSpec((tile_s, D), lambda i: (i, 0)),
                ],
                out_specs=pl.BlockSpec((tile_s, B, D), lambda i: (i, 0, 0)),
            ),
            compiler_params=cparams,
            input_output_aliases={0: 0},
        )(x, pe)

    # nn.Dropout(p=0.1) in eval mode (decoding) is the identity.
    # TODO(synk): training-mode dropout would use pltpu.prng_seed /
    #             pltpu.stateful_bernoulli inside the kernel; omitted since the
    #             decoding variant runs in eval mode.
    return out


if __name__ == "__main__":
    d_model = 128
    max_len = 256
    seq_len = 64
    batch = 2

    key = jax.random.PRNGKey(0)
    x = jax.random.normal(key, (seq_len, batch, d_model), dtype=jnp.float32)
    pe = make_pe_table(d_model, max_len, dtype=x.dtype)

    # Pure-JAX reference of the PyTorch forward: x + pe[:S] (broadcast over batch).
    ref = x + pe[:seq_len][:, None, :]

    out = positional_encoding_forward(x, pe)
    out = jax.block_until_ready(out)

    assert out.shape == (seq_len, batch, d_model)
    assert jnp.allclose(out, ref, atol=1e-6, rtol=1e-6)

    print("KERNEL_OK")
</pallas_src>

<mosaic_0001>
module attributes {stable_mosaic.version = 11 : i64} {
  func.func @_add_pe_kernel_2d(%arg0: i32, %arg1: memref<32x256xf32, #tpu.memory_space<vmem>>, %arg2: memref<32x128xf32, #tpu.memory_space<vmem>>, %arg3: memref<32x256xf32, #tpu.memory_space<vmem>>) attributes {dimension_semantics = [#tpu.dimension_semantics<parallel>], iteration_bounds = array<i64: 2>, scalar_prefetch = 0 : i64, scratch_operands = 0 : i64, tpu.core_type = #tpu.core_type<tc>, window_params = [{transform_indices = @transform_0, window_bounds = array<i64: 32, 256>}, {transform_indices = @transform_1, window_bounds = array<i64: 32, 128>}, {transform_indices = @transform_2, window_bounds = array<i64: 32, 256>}]} {
    %c0 = arith.constant 0 : index
    %c0_0 = arith.constant 0 : index
    %0 = vector.load %arg2[%c0, %c0_0] : memref<32x128xf32, #tpu.memory_space<vmem>>, vector<32x128xf32>
    %c0_1 = arith.constant 0 : index
    %c0_2 = arith.constant 0 : index
    %1 = vector.load %arg1[%c0_1, %c0_2] : memref<32x256xf32, #tpu.memory_space<vmem>>, vector<32x128xf32>
    %2 = arith.addf %1, %0 : vector<32x128xf32>
    %c0_3 = arith.constant 0 : index
    %c0_4 = arith.constant 0 : index
    %3 = vector.load %arg3[%c0_3, %c0_4] : memref<32x256xf32, #tpu.memory_space<vmem>>, vector<32x128xf32>
    tpu.vector_store %arg3[%c0_3, %c0_4], %2 {strides = array<i32>} : memref<32x256xf32, #tpu.memory_space<vmem>>, vector<32x128xf32>,
    %c0_5 = arith.constant 0 : index
    %c128 = arith.constant 128 : index
    %4 = vector.load %arg1[%c0_5, %c128] : memref<32x256xf32, #tpu.memory_space<vmem>>, vector<32x128xf32>
    %5 = arith.addf %4, %0 : vector<32x128xf32>
    %c0_6 = arith.constant 0 : index
    %c128_7 = arith.constant 128 : index
    %6 = vector.load %arg3[%c0_6, %c128_7] : memref<32x256xf32, #tpu.memory_space<vmem>>, vector<32x128xf32>
    tpu.vector_store %arg3[%c0_6, %c128_7], %5 {strides = array<i32>} : memref<32x256xf32, #tpu.memory_space<vmem>>, vector<32x128xf32>,
    return
  }
  func.func @transform_0(%arg0: i32) -> (i32, i32) {
    %c0_i32 = arith.constant 0 : i32
    %c0_i32_0 = arith.constant 0 : i32
    return %arg0, %c0_i32 : i32, i32
  }
  func.func @transform_1(%arg0: i32) -> (i32, i32) {
    %c0_i32 = arith.constant 0 : i32
    %c0_i32_0 = arith.constant 0 : i32
    return %arg0, %c0_i32 : i32, i32
  }
  func.func @transform_2(%arg0: i32) -> (i32, i32) {
    %c0_i32 = arith.constant 0 : i32
    %c0_i32_0 = arith.constant 0 : i32
    return %arg0, %c0_i32 : i32, i32
  }
}

</mosaic_0001>

<bundles_post_ra>
// kernel: tpu_custom_call.1
= control target key start
LH: loop header
LB: loop body
LE: loop exit
PB: predicated region body
PF: predicated region fallthrough
CT: control target
= control target key end

     0   :  { %7 = vsyncpa [#allocation3], 0  ;;  %s683_s0 = inlined_call_operand.hbm [shape: f32[64,256], index: 0, kind: input, shape index: {}, may-alias: {0,2}]   ;;  %s684_s1 = inlined_call_operand.vmem [shape: f32[256,128], index: 1, kind: input, shape index: {}]   ;;  %s685_s2 = inlined_call_operand.hbm [shape: f32[64,256], index: 2, kind: output, shape index: {}, may-alias: {0,2}]  }
   0x1   :  { %9 = vsyncpa [#allocation3 + $0x1], 0 }
   0x2   :  { %10 = vsyncpa [#allocation4], 0 }
   0x3   :  { %12 = vsyncpa [#allocation4 + $0x1], 0  ;;  %s506_s9 = smov 0   ;;  %s508_s10 = smov 0  }
   0x4   :  { %s510_s11 = smov 0   ;;  %s512_s12 = smov 0  }
   0x5 LB: > { %s527_s13 = sadd.s32 4294967295, %s483_s12   ;;  %s315_s14 = sadd.s32 4294967294, %s483_s12   ;;  %s483_s12 = sphi %s512_s12, %s698_s12   ;;  %s479_s11 = sphi %s510_s11, %s697_s11   ;;  %s475_s10 = sphi %s508_s10, %s696_s10   ;;  %s471_s9 = sphi %s506_s9, %s695_s9  }
   0x6   : > { %s531_s15 = sadd.s32 1, %s483_s12   ;;  %s25_s16 = sadd.s32 1, %s479_s11 }
   0x7   : > { %s22_s17 = ssub.s32 %s483_s12, %s531_s15  ;;  %p32_p0 = scmp.ne.s32.totalorder %s479_s11, %s475_s10 }
   0x8   : > { %p23_p1 = scmp.eq.s32.totalorder %s22_s17, 0  ;;  %p33_p2 = scmp.eq.s32.totalorder %s483_s12, 0 }
   0x9   : > { %p38_p3 = scmp.ne.s32.totalorder %s475_s10, %s471_s9  ;;  %p39_p4 = scmp.eq.s32.totalorder %s527_s13, 0 }
   0xa   : > { %s543_s18 = scalar_select %p23_p1, %s479_s11, %s25_s16  }
   0xb   : > { %p545_p5 = por %p33_p2, %p32_p0  ;;  %p549_p6 = por %p39_p4, %p38_p3 }
   0xc   : > { %p88_p7 = scmp.eq.s32.totalorder %s527_s13, 1  ;;  %p94_p8 = scmp.eq.s32.totalorder %s315_s14, 1 }
   0xd   : > { %p349_p10 = scmp.lt.s32.totalorder %s483_s12, 2  ;;  %s114_s23 = sand.u32 1, %s479_s11  }
   0xe   : > { %p556_p11 = por %p88_p7, %p32_p0  ;;  %p560_p12 = por %p94_p8, %p38_p3 }
   0xf   : > { %s334_s24 = sshll.u32 %s483_s12, 10  ;;  %s318_s25 = sshll.u32 %s114_s23, 6 }
  0x10   : > { %s689_s21 = scalar_select %p556_p11, 1, 0 }
  0x11   : > { %s690_s22 = scalar_select %p560_p12, 1, 0 }
  0x12   : > { %s569_s28 = scalar_lea.hbm %s683_s0, %s334_s24  ;;  %s118_s29 = scalar_lea.vmem [#allocation2], %s318_s25 }
  0x13   : > { %s126_s30 = sshll.u32 %s118_s29, 4  ;;  %p573_p13 = pnand %p349_p10, %p545_p5  ;;  %s577_s30 = int_to_ptr.vmem [resolvable:$true] %s126_s30 }
  0x14   : > { %s579_s4 = scalar_lea.sflag [#allocation3], %s114_s23  ;;  %s387_s5 = scalar_lea.hbm %s569_s28, 1024 }
  0x15   : > { %p388_p0 = scmp.ne.s32.totalorder %s569_s28, %s387_s5  ;;  %p389_p1 = pneg %p573_p13 }
  0x16   : > { %s392_s8 = scalar_lea.hbm %s683_s0, 2048  ;;  %p393_p4 = scmp.lt.u32.totalorder %s569_s28, %s683_s0 }
  0x17   : > { %p390_p2 = pnand %p389_p1, %p388_p0  ;;  %p394_p5 = scmp.lt.u32.totalorder %s392_s8, %s387_s5 }
  0x18   : > { %p396_p8 = scmp.lt.u32.totalorder %s387_s5, %s569_s28 }
  0x19   : > { %p391_p3 = pneg %p390_p2  ;;  %p395_p7 = por %p394_p5, %p393_p4 }
  0x1b   : > { %p397_p10 = por %p396_p8, %p395_p7 }
  0x1d   : > { %p398_p9 = pnand %p397_p10, %p391_p3 }
  0x1f   : > { %401 = shalt.err (!%p398_p9)
}
  0x20   : > { %s402_s17 = scalar_lea.vmem %s577_s30, 1024  ;;  %s485_s19 = smov [#allocation2]  }
  0x21   : > { %p403_p0 = scmp.ne.s32.totalorder %s577_s30, %s402_s17  ;;  %s407_s23 = sshll.u32 %s485_s19, 4  ;;  %s408_s23 = int_to_ptr.vmem [resolvable:$false] %s407_s23 }
  0x22   : > { %s409_s24 = scalar_lea.vmem %s408_s23, 2048  ;;  %p410_p11 = scmp.lt.s32.totalorder %s577_s30, %s408_s23 }
  0x23   : > { %p405_p2 = pnand %p403_p0, %p389_p1  ;;  %p411_p4 = scmp.lt.s32.totalorder %s409_s24, %s402_s17 }
  0x25   : > { %p406_p12 = pneg %p405_p2  ;;  %p412_p5 = por %p411_p4, %p410_p11 }
  0x27   : > { %p413_p7 = pnand %p412_p5, %p406_p12 }
  0x29   : > { %416 = shalt.err (!%p413_p7)
}
  0x2a   : > { %s486_s25 = smov 256   ;;  %s487_s26 = smov 16  }
  0x2b   : > { %344 = dma.hbm_to_vmem [thread:$0]  (!%p573_p13), %s569_s28, 1024, %s577_s30, %s579_s4, %s486_s25, %s486_s25, %s487_s26  }
  0x2c   : > { %p322_p9 = scmp.ge.s32.totalorder %s483_s12, 1  ;;  %p143_p1 = scmp.lt.s32.totalorder %s483_s12, 3 }
  0x2e   : > { %p144_p3 = pnand %p322_p9, %p143_p1 }
  0x2f   : > { %s610_s27 = sand.u32 (!%p144_p3), 1, %s475_s10  }
  0x30   : > { %147 = sbr.rel (%p144_p3) target bundleno = 85 (0x55), region = 28  ;;  %s323_s29 = sshll.u32 (!%p144_p3), %s610_s27, 6 }
  0x31   : > { %s150_s5 = scalar_lea.sflag (!%p144_p3), [#allocation3], %s610_s27  ;;  %s153_s6 = scalar_lea.vmem (!%p144_p3), [#allocation2], %s323_s29 }
  0x37   : > { %462 = dma.done.wait (%p549_p6), %s150_s5, 1024  }
  0x38   : > { %464 = vsyncadd (%p549_p6), %s150_s5, 4294966272  ;;  %s325_s28 = sshll.u32 %s527_s13, 2  ;;  %s622_s8 = scalar_lea.vmem [#allocation5], %s323_s29  ;;  %v191_v1 = vld [vmem:[%s153_s6] sm:$0xff]  ;;  %v192_v4 = vld [vmem:[%s153_s6 + $0x10] sm:$0xff] }
  0x39   : > { %p181_p11 = scmp.lt.s32.totalorder %s325_s28, 31  ;;  %s230_s14 = sshll.u32 %s622_s8, 4  ;;  %v193_v6 = vld [vmem:[%s153_s6 + $0x20] sm:$0xff]  ;;  %v194_v10 = vld [vmem:[%s153_s6 + $0x30] sm:$0xff]  ;;  %v203_v11 = vld [vmem:[%s153_s6 + $0x8] sm:$0xff]  ;;  %s626_s14 = int_to_ptr.vmem [resolvable:$true] %s230_s14 }
  0x3a   : > { %s336_s20 = sshll.u32 %s527_s13, 10  ;;  %v204_v14 = vld [vmem:[%s153_s6 + $0x18] sm:$0xff]  ;;  %v205_v15 = vld [vmem:[%s153_s6 + $0x28] sm:$0xff]  ;;  %s216_s19 = scalar_lea.sflag [#allocation4], %s610_s27 }
  0x3b   : > { %s700_s28 = smov (!%p181_p11, %s325_s28), 31  ;;  %v206_v16 = vld [vmem:[%s153_s6 + $0x38] sm:$0xff]  ;;  %s634_s17 = scalar_lea.hbm %s685_s2, %s336_s20 }
  0x3c   : > { %s326_s30 = sshll.u32 %s700_s28, 3  ;;  %s417_s23 = scalar_lea.vmem %s626_s14, 1024 }
  0x3d   : > { %s184_s7 = scalar_lea.vmem %s684_s1, %s326_s30  ;;  %p418_p6 = scmp.ne.s32.totalorder %s626_s14, %s417_s23 }
  0x3e   : > { %v187_v0 = vld [vmem:[%s184_s7] sm:$0xff]  ;;  %v188_v2 = vld [vmem:[%s184_s7 + $0x8] sm:$0xff]  ;;  %v189_v5 = vld [vmem:[%s184_s7 + $0x10] sm:$0xff]  ;;  %p692_p12 = scmp.ne.s32.totalorder %s689_s21, 0  ;;  %s488_s24 = smov [#allocation5]  }
  0x3f   : > { %v195_v3 = vadd.f32 %v191_v1, %v187_v0  ;;  %v196_v7 = vadd.f32 %v192_v4, %v188_v2  ;;  %v197_v8 = vadd.f32 %v193_v6, %v189_v5  ;;  %v190_v9 = vld [vmem:[%s184_s7 + $0x18] sm:$0xff]  ;;  %v207_v13 = vadd.f32 %v203_v11, %v187_v0  ;;  %s421_s25 = sshll.u32 %s488_s24, 4  ;;  %s422_s25 = int_to_ptr.vmem [resolvable:$false] %s421_s25 }
  0x40   : > { %v198_v12 = vadd.f32 %v194_v10, %v190_v9  ;;  %v208_v17 = vadd.f32 %v204_v14, %v188_v2  ;;  %v209_v18 = vadd.f32 %v205_v15, %v189_v5  ;;  %v210_v19 = vadd.f32 %v206_v16, %v190_v9  ;;  %p419_p13 = pnand %p418_p6, %p692_p12  ;;  %s423_s26 = scalar_lea.vmem %s422_s25, 2048 }
  0x41   : > { %199 = vst [vmem:[%s622_s8] sm:$0xff] %v195_v3  ;;  %200 = vst [vmem:[%s622_s8 + $0x10] sm:$0xff] %v196_v7  ;;  %p424_p10 = scmp.lt.s32.totalorder %s626_s14, %s422_s25  ;;  %p425_p0 = scmp.lt.s32.totalorder %s423_s26, %s417_s23 }
  0x42   : > { %201 = vst [vmem:[%s622_s8 + $0x20] sm:$0xff] %v197_v8  ;;  %202 = vst [vmem:[%s622_s8 + $0x30] sm:$0xff] %v198_v12  ;;  %p420_p8 = pneg %p419_p13 }
  0x43   : > { %211 = vst [vmem:[%s622_s8 + $0x8] sm:$0xff] %v207_v13  ;;  %212 = vst [vmem:[%s622_s8 + $0x18] sm:$0xff] %v208_v17  ;;  %p426_p2 = por %p425_p0, %p424_p10 }
  0x44   : > { %213 = vst [vmem:[%s622_s8 + $0x28] sm:$0xff] %v209_v18  ;;  %214 = vst [vmem:[%s622_s8 + $0x38] sm:$0xff] %v210_v19 }
  0x45   : > { %p427_p4 = pnand %p426_p2, %p420_p8 }
  0x47   : > { %430 = shalt.err (!%p427_p4)
}
  0x48   : > { %s431_s29 = scalar_lea.hbm %s634_s17, 1024  ;;  %s435_s28 = scalar_lea.hbm %s685_s2, 2048 }
  0x49   : > { %p432_p5 = scmp.ne.s32.totalorder %s634_s17, %s431_s29  ;;  %p436_p1 = scmp.lt.u32.totalorder %s634_s17, %s685_s2 }
  0x4a   : > { %p437_p3 = scmp.lt.u32.totalorder %s435_s28, %s431_s29  ;;  %p439_p6 = scmp.lt.u32.totalorder %s431_s29, %s634_s17 }
  0x4b   : > { %p433_p7 = pnand %p432_p5, %p692_p12 }
  0x4c   : > { %p438_p11 = por %p437_p3, %p436_p1 }
  0x4d   : > { %p434_p9 = pneg %p433_p7 }
  0x4e   : > { %p440_p13 = por %p439_p6, %p438_p11 }
  0x50   : > { %p441_p8 = pnand %p440_p13, %p434_p9 }
  0x52   : > { %444 = shalt.err (!%p441_p8)
}
  0x53   : > { %s489_s4 = smov 256   ;;  %s490_s7 = smov 16  }
  0x54   : > { %339 = dma.vmem_to_hbm [thread:$0]  (%p692_p12), %s626_s14, 1024, %s634_s17, %s216_s19, %s489_s4, %s489_s4, %s490_s7  }
  0x55 PF: > { %s245_s8 = sand.u32 1, %s471_s9   ;;  %p693_p10 = scmp.ne.s32.totalorder %s690_s22, 0 }
  0x56   : > { %p694_p0 = scmp.ge.s32.totalorder %s483_s12, 2  ;;  %s246_s20 = scalar_lea.sflag [#allocation4], %s245_s8 }
  0x58   : > { %p346_p2 = pnand %p694_p0, %p693_p10 }
  0x5a   : > { %466 = dma.done.wait (!%p346_p2), %s246_s20, 1024  }
  0x5b   : > { %468 = vsyncadd (!%p346_p2), %s246_s20, 4294966272  ;;  %p15_p4 = scmp.ge.s32.totalorder %s531_s15, 4   ;;  %s695_s9 = smov %s475_s10 }
  0x5c   : > { %s696_s10 = smov %s479_s11  ;;  %s697_s11 = smov %s543_s18 }
  0x5d   : > { %s698_s12 = smov %s531_s15  ;;  %17 = sbr.rel (!%p15_p4) target bundleno = 5 (0x5), region = 76 }
  0x64   :  { %251 = vsyncpa [#allocation3], 1 }
  0x65   :  { %253 = vsyncpa [#allocation3 + $0x1], 1 }
  0x66   :  { %254 = vsyncpa [#allocation4], 1 }
  0x67   :  { %256 = vsyncpa [#allocation4 + $0x1], 1 }

</bundles_post_ra>
